<compile_context>
chip_gen: v7x
topology: tpu7x:2x2x1
jax: 0.10.0
libtpu: 0.0.40
codegen_flags: <defaults>
</compile_context>

<pallas_src>
import math
from functools import partial

import numpy as np

import jax
import jax.numpy as jnp
from jax import lax
from jax.experimental import pallas as pl
from jax.experimental.pallas import tpu as pltpu

_LANE = 128      # vreg lane width
_SUBLANE = 8     # vreg sublane count (f32)


def _round_up(x, m):
    return ((x + m - 1) // m) * m


def _lane_pack_factor(num_factors):
    """How many batch rows fit in one 128-lane row (1 if D does not pack)."""
    if num_factors < _LANE and _LANE % num_factors == 0:
        return _LANE // num_factors
    return 1


def _pick_batch_tile(batch, num_factors, k, n_in, n_out,
                     requested=4096, vmem_budget_bytes=12 * 1024 * 1024):
    """Largest batch tile (in original rows) whose double-buffered f32 input
    and (lane-padded) output streams fit a conservative VMEM budget.  The
    tile is a multiple of lcm(8*k, 128) so packed-row blocks stay sublane
    aligned and the batch axis stays 128-aligned."""
    lane_width = k * num_factors
    lane_in = _round_up(lane_width, _LANE)
    lane_out = _round_up(k, _LANE)          # (rows, k) blocks are lane padded
    granule = (8 * k * _LANE) // math.gcd(8 * k, _LANE)   # lcm(8*k, 128)
    rows_per_granule = granule // k
    bytes_per_granule = rows_per_granule * (n_in * lane_in + n_out * lane_out) * 4 * 2
    cap = max(1, vmem_budget_bytes // bytes_per_granule)
    req = max(1, requested // granule)
    need = -(-batch // granule)             # don't tile past the real batch
    g = max(1, min(cap, req, need))
    return g * granule


def _segment_sum_matrix(lane_width, num_factors, k):
    """(lane_width, k) f32 matrix S with S[d, s] = 1 iff lane d belongs to
    packed segment s.  v @ S sums each D-lane segment on the MXU."""
    if k == 1:
        return jnp.ones((lane_width, 1), jnp.float32)
    lane = lax.broadcasted_iota(jnp.int32, (lane_width, k), 0)
    seg = lax.broadcasted_iota(jnp.int32, (lane_width, k), 1)
    lo = seg * num_factors
    mask = (lane >= lo) & (lane < lo + num_factors)
    return jnp.where(mask, 1.0, 0.0)


def _bpr_train_kernel(list_ref, item_ref, neg_ref, pos_ref, neg_out_ref, *,
                      num_factors, k):
    """Per batch tile: pos/neg predicted ratings via packed segment sums."""
    lane_width = list_ref.shape[-1]
    seg = _segment_sum_matrix(lane_width, num_factors, k)
    l = list_ref[...].astype(jnp.float32)
    # Elementwise product on the VPU, segment reduction on the (idle) MXU.
    pos_ref[...] = jnp.dot(l * item_ref[...].astype(jnp.float32), seg,
                           precision=lax.Precision.HIGHEST,
                           preferred_element_type=jnp.float32)
    neg_out_ref[...] = jnp.dot(l * neg_ref[...].astype(jnp.float32), seg,
                               precision=lax.Precision.HIGHEST,
                               preferred_element_type=jnp.float32)


def _bpr_eval_kernel(list_ref, item_ref, pos_ref, *, num_factors, k):
    """Eval path: positive scores only (no dummy negative stream)."""
    lane_width = list_ref.shape[-1]
    seg = _segment_sum_matrix(lane_width, num_factors, k)
    prod = list_ref[...].astype(jnp.float32) * item_ref[...].astype(jnp.float32)
    pos_ref[...] = jnp.dot(prod, seg,
                           precision=lax.Precision.HIGHEST,
                           preferred_element_type=jnp.float32)


def _bpr_forward_impl(list_table, item_table, list_indices, item_indices,
                      item_neg_indices, batch_tile, vmem_budget_bytes):
    B = list_indices.shape[0]
    D = list_table.shape[1]
    train = item_neg_indices is not None
    n_in = 3 if train else 2
    n_out = 2 if train else 1

    k = _lane_pack_factor(D)                 # rows packed per 128-lane row
    lane_width = k * D
    tb = _pick_batch_tile(B, D, k, n_in, n_out,
                          requested=batch_tile,
                          vmem_budget_bytes=vmem_budget_bytes)
    Bp = _round_up(B, tb)
    pad = Bp - B
    if pad:
        # Pad the cheap index vectors (O(pad)), never the (B, D) activations.
        list_indices = jnp.pad(list_indices, (0, pad))
        item_indices = jnp.pad(item_indices, (0, pad))
        if train:
            item_neg_indices = jnp.pad(item_neg_indices, (0, pad))

    def gather_packed(table, idx):
        # Gather + free (contiguous, row-major) lane-packing reshape.
        return jnp.take(table, idx, axis=0).reshape(Bp // k, lane_width)

    list_e = gather_packed(list_table, list_indices)
    item_e = gather_packed(item_table, item_indices)

    rows_per_tile = tb // k
    grid = (Bp // tb,)
    in_spec = pl.BlockSpec((rows_per_tile, lane_width), lambda b: (b, 0))
    out_spec = pl.BlockSpec((rows_per_tile, k), lambda b: (b, 0))

    cparams = pltpu.CompilerParams(
        dimension_semantics=("parallel",),
        vmem_limit_bytes=32 * 1024 * 1024,
        # Let XLA fuse the jnp.take producers into the kernel operands so the
        # gathered rows are not materialized in HBM and re-read.
        allow_input_fusion=[True] * n_in,
    )

    if train:
        neg_e = gather_packed(item_table, item_neg_indices)
        pos_p, neg_p = pl.pallas_call(
            partial(_bpr_train_kernel, num_factors=D, k=k),
            out_shape=(
                jax.ShapeDtypeStruct((Bp // k, k), jnp.float32),
                jax.ShapeDtypeStruct((Bp // k, k), jnp.float32),
            ),
            grid_spec=pltpu.PrefetchScalarGridSpec(
                num_scalar_prefetch=0,
                grid=grid,
                in_specs=[in_spec, in_spec, in_spec],
                out_specs=[out_spec, out_spec]),
            compiler_params=cparams,
        )(list_e, item_e, neg_e)
        # (Bp//k, k) row-major == original batch order; reshape is free.
        return pos_p.reshape(Bp)[:B], neg_p.reshape(Bp)[:B]

    pos_p = pl.pallas_call(
        partial(_bpr_eval_kernel, num_factors=D, k=k),
        out_shape=jax.ShapeDtypeStruct((Bp // k, k), jnp.float32),
        grid_spec=pltpu.PrefetchScalarGridSpec(
            num_scalar_prefetch=0,
            grid=grid,
            in_specs=[in_spec, in_spec],
            out_specs=out_spec),
        compiler_params=cparams,
    )(list_e, item_e)
    return pos_p.reshape(Bp)[:B]


@partial(jax.jit, static_argnames=("batch_tile", "vmem_budget_bytes"))
def bpr_forward_train(list_table, item_table, list_indices, item_indices,
                      item_neg_indices, batch_tile=4096,
                      vmem_budget_bytes=12 * 1024 * 1024):
    return _bpr_forward_impl(list_table, item_table, list_indices,
                             item_indices, item_neg_indices,
                             batch_tile, vmem_budget_bytes)


@partial(jax.jit, static_argnames=("batch_tile", "vmem_budget_bytes"))
def bpr_forward_eval(list_table, item_table, list_indices, item_indices,
                     batch_tile=4096, vmem_budget_bytes=12 * 1024 * 1024):
    return _bpr_forward_impl(list_table, item_table, list_indices,
                             item_indices, None,
                             batch_tile, vmem_budget_bytes)


def xavier_uniform(key, shape, dtype=jnp.float32):
    fan_in, fan_out = shape[0], shape[1]
    bound = float(np.sqrt(6.0 / (fan_in + fan_out)))
    return jax.random.uniform(key, shape, dtype, minval=-bound, maxval=bound)


class BPR:
    """JAX/Pallas port of the PyTorch BPR module (forward pass only)."""

    def __init__(self, num_user, num_list, num_item, num_factors, key):
        ku, kl, ki = jax.random.split(key, 3)
        self.user_embeddings = xavier_uniform(ku, (num_user, num_factors))
        self.list_embeddings = xavier_uniform(kl, (num_list, num_factors))
        self.item_embeddings = xavier_uniform(ki, (num_item, num_factors))

    def forward(self, user_pos_indices, user_neg_indices, list_indices,
                item_indices, item_neg_indices=None, param5=None,
                param6=None, train=False, batch_tile=4096):
        # Dropout layers are identity here (eval-mode determinism).
        if train:
            assert item_neg_indices is not None
            return bpr_forward_train(
                self.list_embeddings, self.item_embeddings,
                list_indices, item_indices, item_neg_indices,
                batch_tile=batch_tile)
        return bpr_forward_eval(
            self.list_embeddings, self.item_embeddings,
            list_indices, item_indices, batch_tile=batch_tile)


def _check(model, list_idx, item_idx, neg_idx, batch_tile):
    pred_pos, pred_neg = model.forward(
        None, None, list_idx, item_idx, item_neg_indices=neg_idx,
        train=True, batch_tile=batch_tile)
    pred_eval = model.forward(None, None, list_idx, item_idx,
                              train=False, batch_tile=batch_tile)
    jax.block_until_ready((pred_pos, pred_neg, pred_eval))

    le = jnp.take(model.list_embeddings, list_idx, axis=0)
    ie = jnp.take(model.item_embeddings, item_idx, axis=0)
    ne = jnp.take(model.item_embeddings, neg_idx, axis=0)
    ref_pos = jnp.sum(le * ie, axis=1)
    ref_neg = jnp.sum(le * ne, axis=1)
    np.testing.assert_allclose(np.asarray(pred_pos), np.asarray(ref_pos),
                               rtol=1e-5, atol=1e-5)
    np.testing.assert_allclose(np.asarray(pred_neg), np.asarray(ref_neg),
                               rtol=1e-5, atol=1e-5)
    np.testing.assert_allclose(np.asarray(pred_eval), np.asarray(ref_pos),
                               rtol=1e-5, atol=1e-5)
    assert pred_pos.shape == (list_idx.shape[0],)
    assert pred_neg.shape == (list_idx.shape[0],)
    assert pred_eval.shape == (list_idx.shape[0],)


if __name__ == "__main__":
    key = jax.random.PRNGKey(0)
    k_model, k_li, k_it, k_neg, k_li2, k_it2, k_neg2 = jax.random.split(key, 7)

    num_user, num_list, num_item, num_factors = 10, 12, 15, 32
    model = BPR(num_user, num_list, num_item, num_factors, k_model)

    # Small batch: single grid step, heavy padding path.
    batch = 16
    list_indices = jax.random.randint(k_li, (batch,), 0, num_list)
    item_indices = jax.random.randint(k_it, (batch,), 0, num_item)
    item_neg_indices = jax.random.randint(k_neg, (batch,), 0, num_item)
    _check(model, list_indices, item_indices, item_neg_indices,
           batch_tile=4096)

    # Larger batch with a small forced tile: multi-step grid + padding path.
    batch2 = 1000
    list_indices2 = jax.random.randint(k_li2, (batch2,), 0, num_list)
    item_indices2 = jax.random.randint(k_it2, (batch2,), 0, num_item)
    item_neg_indices2 = jax.random.randint(k_neg2, (batch2,), 0, num_item)
    _check(model, list_indices2, item_indices2, item_neg_indices2,
           batch_tile=256)

    print("KERNEL_OK")
</pallas_src>

<mosaic_0001>
module attributes {stable_mosaic.version = 11 : i64} {
  func.func @_bpr_train_kernel(%arg0: i32, %arg1: memref<32x128xf32, #tpu.memory_space<vmem>>, %arg2: memref<32x128xf32, #tpu.memory_space<vmem>>, %arg3: memref<32x128xf32, #tpu.memory_space<vmem>>, %arg4: memref<32x4xf32, #tpu.memory_space<vmem>>, %arg5: memref<32x4xf32, #tpu.memory_space<vmem>>) attributes {dimension_semantics = [#tpu.dimension_semantics<parallel>], iteration_bounds = array<i64: 1>, scalar_prefetch = 0 : i64, scratch_operands = 0 : i64, tpu.core_type = #tpu.core_type<tc>, window_params = [{transform_indices = @transform_0, window_bounds = array<i64: 32, 128>}, {transform_indices = @transform_1, window_bounds = array<i64: 32, 128>}, {transform_indices = @transform_2, window_bounds = array<i64: 32, 128>}, {transform_indices = @transform_3, window_bounds = array<i64: 32, 4>}, {transform_indices = @transform_4, window_bounds = array<i64: 32, 4>}]} {
    %0 = tpu.iota {dimensions = array<i32: 0>} : vector<128x4xi32>
    %1 = tpu.iota {dimensions = array<i32: 1>} : vector<128x4xi32>
    %c32_i32 = arith.constant 32 : i32
    %2 = vector.broadcast %c32_i32 : i32 to vector<128x4xi32>
    %3 = arith.muli %1, %2 : vector<128x4xi32>
    %4 = arith.cmpi sge, %0, %3 : vector<128x4xi32>
    %c32_i32_0 = arith.constant 32 : i32
    %5 = vector.broadcast %c32_i32_0 : i32 to vector<128x4xi32>
    %6 = arith.addi %3, %5 : vector<128x4xi32>
    %7 = arith.cmpi slt, %0, %6 : vector<128x4xi32>
    %8 = arith.andi %4, %7 : vector<128x4xi1>
    %cst = arith.constant 1.000000e+00 : f32
    %cst_1 = arith.constant 0.000000e+00 : f32
    %9 = vector.broadcast %cst : f32 to vector<128x4xf32>
    %10 = vector.broadcast %cst_1 : f32 to vector<128x4xf32>
    %11 = arith.select %8, %9, %10 : vector<128x4xi1>, vector<128x4xf32>
    %c0 = arith.constant 0 : index
    %c0_2 = arith.constant 0 : index
    %12 = vector.load %arg1[%c0, %c0_2] : memref<32x128xf32, #tpu.memory_space<vmem>>, vector<32x128xf32>
    %c0_3 = arith.constant 0 : index
    %c0_4 = arith.constant 0 : index
    %13 = vector.load %arg2[%c0_3, %c0_4] : memref<32x128xf32, #tpu.memory_space<vmem>>, vector<32x128xf32>
    %14 = arith.mulf %12, %13 : vector<32x128xf32>
    %cst_5 = arith.constant dense<0.000000e+00> : vector<32x4xf32>
    %15 = tpu.matmul %14, %11, %cst_5 {dimension_numbers = #tpu.dot_dimension_numbers<[1], [0], [0], [1], [0, 0, 1, 1], [], []>, precision = #tpu.contract_precision<fp32>} : vector<32x128xf32>, vector<128x4xf32>, vector<32x4xf32> -> vector<32x4xf32>
    %c0_6 = arith.constant 0 : index
    %c0_7 = arith.constant 0 : index
    %16 = vector.load %arg4[%c0_6, %c0_7] : memref<32x4xf32, #tpu.memory_space<vmem>>, vector<32x4xf32>
    tpu.vector_store %arg4[%c0_6, %c0_7], %15 {strides = array<i32>} : memref<32x4xf32, #tpu.memory_space<vmem>>, vector<32x4xf32>,
    %c0_8 = arith.constant 0 : index
    %c0_9 = arith.constant 0 : index
    %17 = vector.load %arg3[%c0_8, %c0_9] : memref<32x128xf32, #tpu.memory_space<vmem>>, vector<32x128xf32>
    %18 = arith.mulf %12, %17 : vector<32x128xf32>
    %cst_10 = arith.constant dense<0.000000e+00> : vector<32x4xf32>
    %19 = tpu.matmul %18, %11, %cst_10 {dimension_numbers = #tpu.dot_dimension_numbers<[1], [0], [0], [1], [0, 0, 1, 1], [], []>, precision = #tpu.contract_precision<fp32>} : vector<32x128xf32>, vector<128x4xf32>, vector<32x4xf32> -> vector<32x4xf32>
    %c0_11 = arith.constant 0 : index
    %c0_12 = arith.constant 0 : index
    %20 = vector.load %arg5[%c0_11, %c0_12] : memref<32x4xf32, #tpu.memory_space<vmem>>, vector<32x4xf32>
    tpu.vector_store %arg5[%c0_11, %c0_12], %19 {strides = array<i32>} : memref<32x4xf32, #tpu.memory_space<vmem>>, vector<32x4xf32>,
    return
  }
  func.func @transform_0(%arg0: i32) -> (i32, i32) {
    %c0_i32 = arith.constant 0 : i32
    %c0_i32_0 = arith.constant 0 : i32
    return %arg0, %c0_i32 : i32, i32
  }
  func.func @transform_1(%arg0: i32) -> (i32, i32) {
    %c0_i32 = arith.constant 0 : i32
    %c0_i32_0 = arith.constant 0 : i32
    return %arg0, %c0_i32 : i32, i32
  }
  func.func @transform_2(%arg0: i32) -> (i32, i32) {
    %c0_i32 = arith.constant 0 : i32
    %c0_i32_0 = arith.constant 0 : i32
    return %arg0, %c0_i32 : i32, i32
  }
  func.func @transform_3(%arg0: i32) -> (i32, i32) {
    %c0_i32 = arith.constant 0 : i32
    %c0_i32_0 = arith.constant 0 : i32
    return %arg0, %c0_i32 : i32, i32
  }
  func.func @transform_4(%arg0: i32) -> (i32, i32) {
    %c0_i32 = arith.constant 0 : i32
    %c0_i32_0 = arith.constant 0 : i32
    return %arg0, %c0_i32 : i32, i32
  }
}

</mosaic_0001>

<bundles_post_ra>
// kernel: bpr_forward_train.2
= control target key start
LH: loop header
LB: loop body
LE: loop exit
PB: predicated region body
PF: predicated region fallthrough
CT: control target
= control target key end

     0   :  { %s3848_s0 = inlined_call_operand.vmem [shape: f32[32,128], index: 0, kind: input, shape index: {}]   ;;  %s3849_s1 = inlined_call_operand.vmem [shape: f32[32,128], index: 1, kind: input, shape index: {}]   ;;  %s3850_s2 = inlined_call_operand.vmem [shape: pred[32,128], index: 2, kind: input, shape index: {}]   ;;  %s3851_s3 = inlined_call_operand.vmem [shape: f32[32,128], index: 3, kind: input, shape index: {}]   ;;  %s3852_s4 = inlined_call_operand.<no memory space> [shape: f32[], index: 4, kind: input, shape index: {}]   ;;  %s3853_s5 = inlined_call_operand.vmem [shape: f32[32,4], index: 5, kind: output, shape index: {0}]   ;;  %s3854_s6 = inlined_call_operand.vmem [shape: f32[32,4], index: 6, kind: output, shape index: {1}]  }
   0x1   :  { %v2825_v0 = vstv %s3852_s4 }
   0x2   :  { %v82_v1 = vlaneseq  ;;  %v2835_v6 = vld [vmem:[%s3850_s2] sm:$0xff]   ;;  %v3867_v22 = vmov 1.0|1.0   ;;  %v1553_v36 = vld [vmem:[%s3851_s3 + $0x8] sm:$0xff]  ;;  %v2786_v39 = vmov 0.0   ;;  %v3905_v41 = vmov 0 }
   0x3   :  { %v1656_v10 = vunpack.c.0.s8 %v2835_v6  ;;  %v1657_v11 = vunpack.c.1.s8 %v2835_v6  ;;  %v26_v28 = vld [vmem:[%s3851_s3] sm:$0xff]  ;;  %v172_v44 = vld [vmem:[%s3848_s0 + $0x8] sm:$0xff]  ;;  %v3914_v53 = vmov 0  ;;  %v1660_v50 = vunpack.c.2.s8 %v2835_v6 }
   0x4   :  { %v2827_v2 = vshrl.u32 %v82_v1, 7  ;;  %v100_v3 = vand.u32 127, %v82_v1  ;;  %v171_v31 = vld [vmem:[%s3848_s0] sm:$0xff]  ;;  %v859_v45 = vld [vmem:[%s3849_s1 + $0x8] sm:$0xff] }
   0x5   :  { %vm2880_vm11 = vcmp.ne.s32.totalorder %v1656_v10, 0  ;;  %v858_v35 = vld [vmem:[%s3849_s1] sm:$0xff] }
   0x6   :  { %v84_v4 = vadd.s32 8, %v2827_v2  ;;  %v2830_v5 = vmul.u32 32, %v100_v3  ;;  %v85_v7 = vadd.s32 16, %v2827_v2  ;;  %v86_v9 = vadd.s32 24, %v2827_v2 }
   0x7   :  { %v87_v12 = vadd.s32 32, %v2827_v2  ;;  %v88_v13 = vadd.s32 40, %v2827_v2  ;;  %v89_v15 = vadd.s32 48, %v2827_v2  ;;  %v90_v17 = vadd.s32 56, %v2827_v2 }
   0x8   :  { %vm102_vm0 = vcmp.ge.s32.totalorder %v2827_v2, %v2830_v5  ;;  %v2841_v8 = vadd.s32 32, %v2830_v5  ;;  %vm103_vm1 = vcmp.ge.s32.totalorder %v84_v4, %v2830_v5  ;;  %vm104_vm5 = vcmp.ge.s32.totalorder %v85_v7, %v2830_v5 }
   0x9   :  { %vm105_vm8 = vcmp.ge.s32.totalorder %v86_v9, %v2830_v5  ;;  %v2875_v19 = vadd.s32 64, %v2827_v2  ;;  %v2878_v20 = vadd.s32 72, %v2827_v2  ;;  %vm106_vm13 = vcmp.ge.s32.totalorder %v87_v12, %v2830_v5 }
   0xa   :  { %vm119_vm2 = vcmp.lt.s32.totalorder %v2827_v2, %v2841_v8  ;;  %vm120_vm3 = vcmp.lt.s32.totalorder %v84_v4, %v2841_v8  ;;  %vm121_vm6 = vcmp.lt.s32.totalorder %v85_v7, %v2841_v8  ;;  %vm122_vm9 = vcmp.lt.s32.totalorder %v86_v9, %v2841_v8  ;;  %v1555_v4 = vld [vmem:[%s3851_s3 + $0x10] sm:$0xff] }
   0xb   :  { %vm2852_vm4 = vmand %vm102_vm0, %vm119_vm2  ;;  %vm107_vm14 = vcmp.ge.s32.totalorder %v88_v13, %v2830_v5  ;;  %vm123_vm15 = vcmp.lt.s32.totalorder %v87_v12, %v2841_v8  ;;  %vm2897_vm0 = vcmp.ne.s32.totalorder %v1657_v11, 0  ;;  %vm124_vm2 = vcmp.lt.s32.totalorder %v88_v13, %v2841_v8 }
   0xc   :  { %vm2859_vm7 = vmand %vm103_vm1, %vm120_vm3  ;;  %v2918_v26 = vadd.s32 80, %v2827_v2  ;;  %v2921_v27 = vadd.s32 88, %v2827_v2  ;;  %v2938_v30 = vadd.s32 96, %v2827_v2  ;;  %v2962_v33 = vadd.s32 104, %v2827_v2 }
   0xd   :  { %vm2870_vm10 = vmpackc.low %vm2859_vm7, %vm2852_vm4  ;;  %v2965_v34 = vadd.s32 112, %v2827_v2  ;;  %v30_v38 = vsel %vm2880_vm11, %v26_v28, %v2825_v0  ;;  %v151_v40 = vsel %vm2852_vm4, 1.0, %v2786_v39  ;;  %v3010_v42 = vadd.s32 120, %v2827_v2 }
   0xe   :  { %2359 = vmatprep.subr.msk.bf16.mxu0 %vm2870_vm10, %v3867_v22  ;;  %2551 = vmatprep.subr.msk.bf16.mxu1 %vm2870_vm10, %v3867_v22  ;;  %vm2890_vm12 = vmand %vm104_vm5, %vm121_vm6  ;;  %v175_v43 = vmul.f32 %v171_v31, %v30_v38  ;;  %v152_v47 = vsel %vm2859_vm7, 1.0, %v2786_v39  ;;  %v862_v48 = vmul.f32 %v858_v35, %v30_v38  ;;  %v45_v49 = vsel %vm2897_vm0, %v1553_v36, %v2825_v0 }
   0xf   :  { %2361 = vmatpush3.bf16.msk.msra.mxu0 %vm2870_vm10, %v3867_v22  ;;  %2553 = vmatpush3.bf16.msk.msra.mxu1 %vm2870_vm10, %v3867_v22  ;;  %vm2911_vm1 = vmand %vm105_vm8, %vm122_vm9  ;;  %vm125_vm8 = vcmp.lt.s32.totalorder %v89_v15, %v2841_v8  ;;  %vm3910_vm3 = vcmp.lt.s32.totalorder %v90_v17, %v2841_v8  ;;  %vm3911_vm9 = vcmp.ge.s32.totalorder %v90_v17, %v2830_v5  ;;  %v153_v57 = vsel %vm2890_vm12, 1.0, %v2786_v39 }
  0x10   :  { %vm2930_vm5 = vmpackc.low %vm2911_vm1, %vm2890_vm12  ;;  %v3052_v51 = vand.u32 4294901760, %v175_v43  ;;  %v3054_v52 = vsub.f32 %v151_v40, %v151_v40  ;;  %v3064_v54 = vand.u32 4294901760, %v862_v48  ;;  %v176_v55 = vmul.f32 %v172_v44, %v45_v49 }
  0x11   :  { %2363 = vmatprep.subr.msk.bf16.mxu0 %vm2930_vm5, %v3867_v22  ;;  %2555 = vmatprep.subr.msk.bf16.mxu1 %vm2930_vm5, %v3867_v22  ;;  %vm2953_vm6 = vmand %vm106_vm13, %vm123_vm15  ;;  %vm127_vm15 = vcmp.lt.s32.totalorder %v2875_v19, %v2841_v8  ;;  %v863_v56 = vmul.f32 %v859_v45, %v45_v49  ;;  %vm3916_vm0 = vcmp.ge.s32.totalorder %v2875_v19, %v2830_v5  ;;  %v154_v63 = vsel %vm2911_vm1, 1.0, %v2786_v39 }
  0x12   :  { %vm2977_vm13 = vmand %vm107_vm14, %vm124_vm2  ;;  %vm3907_vm2 = vcmp.ge.s32.totalorder %v89_v15, %v2830_v5  ;;  %v3088_v59 = vsub.f32 %v175_v43, %v3052_v51  ;;  %v3090_v60 = vsub.f32 %v152_v47, %v152_v47  ;;  %v3113_v62 = vsub.f32 %v862_v48, %v3064_v54 }
  0x13   :  { %2365 = vmatpush3.bf16.msk.msra.mxu0 %vm2930_vm5, %v3867_v22  ;;  %2557 = vmatpush3.bf16.msk.msra.mxu1 %vm2930_vm5, %v3867_v22  ;;  %vm3001_vm14 = vmpackc.low %vm2977_vm13, %vm2953_vm6  ;;  %v3131_v3 = vsub.f32 %v153_v57, %v153_v57  ;;  %vm3925_vm1 = vcmp.lt.s32.totalorder %v2918_v26, %v2841_v8  ;;  %vm3926_vm12 = vcmp.ge.s32.totalorder %v2918_v26, %v2830_v5  ;;  %v286_v7 = vand.u32 4294901760, %v3054_v52 }
  0x14   :  { %v3906_v41 = vsel %vm3001_vm14, 4294967295, %v3905_v41  ;;  %2367 = vmatprep.subr.msk.bf16.mxu0 %vm3001_vm14, %v3867_v22  ;;  %2559 = vmatprep.subr.msk.bf16.mxu1 %vm3001_vm14, %v3867_v22  ;;  %vm3028_vm4 = vmand %vm3907_vm2, %vm125_vm8  ;;  %v3862_v2 = vand.u32 4294901760, %v3088_v59  ;;  %v3861_v9 = vand.u32 4294901760, %v3113_v62  ;;  %v3145_v10 = vand.u32 4294901760, %v176_v55 }
  0x15   :  { %vm3044_vm8 = vmand %vm3911_vm9, %vm3910_vm3  ;;  %vm3919_vm9 = vcmp.lt.s32.totalorder %v2878_v20, %v2841_v8  ;;  %v3147_v11 = vand.u32 4294901760, %v863_v56  ;;  %v292_v14 = vand.u32 4294901760, %v3090_v60  ;;  %v3169_v15 = vsub.f32 %v154_v63, %v154_v63 }
  0x16   :  { %vm3060_vm7 = vmpackc.low %vm3044_vm8, %vm3028_vm4  ;;  %v247_v13 = vsub.f32 %v3088_v59, %v3862_v2  ;;  %v155_v16 = vsel %vm2953_vm6, 1.0, %v2786_v39  ;;  %v934_v19 = vsub.f32 %v3113_v62, %v3861_v9  ;;  %v298_v24 = vand.u32 4294901760, %v3131_v3 }
  0x17   :  { %v3915_v53 = vsel %vm3060_vm7, 4294967295, %v3914_v53  ;;  %2369 = vmatpush3.bf16.msk.msra.mxu0 %vm3001_vm14, %v3867_v22  ;;  %2561 = vmatpush3.bf16.msk.msra.mxu1 %vm3001_vm14, %v3867_v22  ;;  %vm3081_vm3 = vmand %vm3916_vm0, %vm127_vm15  ;;  %vm3920_vm15 = vcmp.ge.s32.totalorder %v2878_v20, %v2830_v5  ;;  %v156_v20 = vsel %vm2977_vm13, 1.0, %v2786_v39  ;;  %v3209_v25 = vsub.f32 %v155_v16, %v155_v16 }
  0x18   :  { %2371 = vmatprep.subr.msk.bf16.mxu0 %vm3060_vm7, %v3867_v22  ;;  %2563 = vmatprep.subr.msk.bf16.mxu1 %vm3060_vm7, %v3867_v22  ;;  %vm3104_vm0 = vmand %vm3920_vm15, %vm3919_vm9  ;;  %vm3935_vm15 = vcmp.lt.s32.totalorder %v2938_v30, %v2841_v8  ;;  %v248_v23 = vand.u32 4294901760, %v247_v13  ;;  %v3211_v26 = vsub.f32 %v156_v20, %v156_v20  ;;  %vm3939_vm13 = vcmp.lt.s32.totalorder %v2962_v33, %v2841_v8 }
  0x19   :  { %vm3122_vm9 = vmpackc.low %vm3104_vm0, %vm3081_vm3  ;;  %vm3940_vm6 = vcmp.ge.s32.totalorder %v2962_v33, %v2830_v5  ;;  %v935_v28 = vand.u32 4294901760, %v934_v19  ;;  %v3227_v31 = vsub.f32 %v863_v56, %v3147_v11  ;;  %v157_v32 = vsel %vm3028_vm4, 1.0, %v2786_v39 }
  0x1a   :  { %vm3139_vm2 = vmand %vm3926_vm12, %vm3925_vm1  ;;  %vm3929_vm12 = vcmp.lt.s32.totalorder %v2921_v27, %v2841_v8  ;;  %vm3930_vm1 = vcmp.ge.s32.totalorder %v2921_v27, %v2830_v5  ;;  %v287_v33 = vsub.f32 %v3054_v52, %v286_v7  ;;  %v293_v35 = vsub.f32 %v3090_v60, %v292_v14  ;;  %1934 = vmatprep.mubr.f32.mxu0 %v248_v23 }
  0x1b   :  { %2373 = vmatpush3.bf16.msk.msra.mxu0 %vm3060_vm7, %v3867_v22  ;;  %2565 = vmatpush3.bf16.msk.msra.mxu1 %vm3060_vm7, %v3867_v22  ;;  %vm3161_vm11 = vmand %vm3930_vm1, %vm3929_vm12  ;;  %vm3936_vm7 = vcmp.ge.s32.totalorder %v2938_v30, %v2830_v5  ;;  %v3224_v30 = vsub.f32 %v176_v55, %v3145_v10  ;;  %v3871_v36 = vand.u32 4294901760, %v3169_v15  ;;  %v158_v37 = vsel %vm3044_vm8, 1.0, %v2786_v39 }
  0x1c   :  { %2375 = vmatprep.subr.msk.bf16.mxu0 %vm3122_vm9, %v3867_v22  ;;  %2567 = vmatprep.subr.msk.bf16.mxu1 %vm3122_vm9, %v3867_v22  ;;  %vm3184_vm12 = vmpackc.low %vm3161_vm11, %vm3139_vm2  ;;  %v3943_v38 = vmov 0  ;;  %v3866_v40 = vand.u32 4294901760, %v3209_v25  ;;  %v3263_v43 = vsub.f32 %v157_v32, %v157_v32  ;;  %v3265_v44 = vsub.f32 %v158_v37, %v158_v37 }
  0x1d   :  { %vm3204_vm14 = vmand %vm3936_vm7, %vm3935_vm15  ;;  %v159_v45 = vsel %vm3081_vm3, 1.0, %v2786_v39  ;;  %vm3946_vm8 = vcmp.lt.s32.totalorder %v2965_v34, %v2841_v8  ;;  %vm3947_vm7 = vcmp.ge.s32.totalorder %v2965_v34, %v2830_v5  ;;  %2162 = vmatprep.mubr.f32.mxu1 %v935_v28  ;;  %v3865_v47 = vand.u32 4294901760, %v3211_v26 }
  0x1e   :  { %vm3219_vm1 = vmand %vm3940_vm6, %vm3939_vm13  ;;  %v160_v48 = vsel %vm3104_vm0, 1.0, %v2786_v39  ;;  %v3284_v49 = vsub.f32 %v159_v45, %v159_v45  ;;  %vm3950_vm3 = vcmp.lt.s32.totalorder %v3010_v42, %v2841_v8  ;;  %vm3951_vm6 = vcmp.ge.s32.totalorder %v3010_v42, %v2830_v5 }
  0x1f   :  { %2377 = vmatpush3.bf16.msk.msra.mxu0 %vm3122_vm9, %v3867_v22  ;;  %2569 = vmatpush3.bf16.msk.msra.mxu1 %vm3122_vm9, %v3867_v22  ;;  %vm3258_vm4 = vmpackc.low %vm3219_vm1, %vm3204_vm14  ;;  %v3860_v55 = vand.u32 4294901760, %v3224_v30  ;;  %v3859_v56 = vand.u32 4294901760, %v3227_v31  ;;  %v1661_v57 = vunpack.c.3.s8 %v2835_v6  ;;  %v299_v5 = vsub.f32 %v3131_v3, %v298_v24 }
  0x20   :  { %2379 = vmatprep.subr.msk.bf16.mxu0 %vm3184_vm12, %v3867_v22  ;;  %2571 = vmatprep.subr.msk.bf16.mxu1 %vm3184_vm12, %v3867_v22  ;;  %v3944_v38 = vsel %vm3258_vm4, 4294967295, %v3943_v38  ;;  %vm3276_vm15 = vmand %vm3947_vm7, %vm3946_vm8  ;;  %v3864_v8 = vand.u32 4294901760, %v3263_v43  ;;  %v3863_v42 = vand.u32 4294901760, %v3265_v44  ;;  %v3311_v58 = vsub.f32 %v160_v48, %v160_v48 }
  0x21   :  { %3945 = vst [vmem:[#allocation3_spill] sm:$0xff] %v3944_v38  ;;  %vm3293_vm13 = vmand %vm3951_vm6, %vm3950_vm3  ;;  %v288_v6 = vand.u32 4294901760, %v287_v33  ;;  %v294_v61 = vand.u32 4294901760, %v293_v35  ;;  %v305_v63 = vsub.f32 %v3169_v15, %v3871_v36  ;;  %v311_v13 = vsub.f32 %v3209_v25, %v3866_v40  ;;  %v860_v40 = vld [vmem:[%s3849_s1 + $0x10] sm:$0xff] }
  0x22   :  { %vm3329_vm0 = vmpackc.low %vm3293_vm13, %vm3276_vm15  ;;  %v3954_v16 = vmov 0  ;;  %v317_v19 = vsub.f32 %v3211_v26, %v3865_v47  ;;  %v3870_v20 = vand.u32 4294901760, %v3284_v49  ;;  %v161_v23 = vsel %vm3139_vm2, 1.0, %v2786_v39 }
  0x23   :  { %2381 = vmatpush3.bf16.msk.msra.mxu0 %vm3184_vm12, %v3867_v22  ;;  %2573 = vmatpush3.bf16.msk.msra.mxu1 %vm3184_vm12, %v3867_v22  ;;  %v3955_v16 = vsel %vm3329_vm0, 4294967295, %v3954_v16  ;;  %vm3340_vm8 = vcmp.ne.s32.totalorder %v1660_v50, 0  ;;  %v257_v32 = vsub.f32 %v3224_v30, %v3860_v55  ;;  %v944_v33 = vsub.f32 %v3227_v31, %v3859_v56 }
  0x24   :  { %2383 = vmatprep.subr.msk.bf16.mxu0 %vm3258_vm4, %v3867_v22  ;;  %2575 = vmatprep.subr.msk.bf16.mxu1 %vm3258_vm4, %v3867_v22  ;;  %3956 = vst [vmem:[#allocation4_spill] sm:$0xff] %v3955_v16  ;;  %v162_v35 = vsel %vm3161_vm11, 1.0, %v2786_v39  ;;  %vm3356_vm2 = vcmp.ne.s32.totalorder %v1661_v57, 0  ;;  %v300_v45 = vand.u32 4294901760, %v299_v5  ;;  %v323_v12 = vsub.f32 %v3263_v43, %v3864_v8  ;;  %v173_v57 = vld [vmem:[%s3848_s0 + $0x10] sm:$0xff] }
  0x25   :  { %v329_v48 = vsub.f32 %v3265_v44, %v3863_v42  ;;  %v3869_v50 = vand.u32 4294901760, %v3311_v58  ;;  %v2390_v5 = vpack.c.bf16 %v294_v61, %v288_v6  ;;  %v306_v56 = vand.u32 4294901760, %v305_v63 }
  0x26   :  { %v312_v55 = vand.u32 4294901760, %v311_v13  ;;  %v3382_v9 = vsub.f32 %v161_v23, %v161_v23  ;;  %v318_v2 = vand.u32 4294901760, %v317_v19  ;;  %v335_v42 = vsub.f32 %v3284_v49, %v3870_v20  ;;  %v1557_v19 = vld [vmem:[%s3851_s3 + $0x18] sm:$0xff] }
  0x27   :  { %2385 = vmatpush3.bf16.msk.msra.mxu0 %vm3258_vm4, %v3867_v22  ;;  %2577 = vmatpush3.bf16.msk.msra.mxu1 %vm3258_vm4, %v3867_v22  ;;  %v3387_v8 = vsub.f32 %v162_v35, %v162_v35  ;;  %v61_v47 = vsel %vm3340_vm8, %v1555_v4, %v2825_v0  ;;  %v258_v6 = vand.u32 4294901760, %v257_v32  ;;  %v945_v61 = vand.u32 4294901760, %v944_v33 }
  0x28   :  { %2387 = vmatprep.subr.msk.bf16.mxu0 %vm3329_vm0, %v3867_v22  ;;  %2579 = vmatprep.subr.msk.bf16.mxu1 %vm3329_vm0, %v3867_v22  ;;  %v163_v63 = vsel %vm3204_vm14, 1.0, %v2786_v39  ;;  %v177_v13 = vmul.f32 %v173_v57, %v61_v47  ;;  %v324_v23 = vand.u32 4294901760, %v323_v12  ;;  %v330_v28 = vand.u32 4294901760, %v329_v48  ;;  %v174_v12 = vld [vmem:[%s3848_s0 + $0x18] sm:$0xff] }
  0x29   :  { %v341_v21 = vsub.f32 %v3311_v58, %v3869_v50  ;;  %v164_v32 = vsel %vm3219_vm1, 1.0, %v2786_v39  ;;  %v2394_v33 = vpack.c.bf16 %v306_v56, %v300_v45  ;;  %v3874_v35 = vand.u32 4294901760, %v3382_v9  ;;  %v861_v48 = vld [vmem:[%s3849_s1 + $0x18] sm:$0xff] }
  0x2a   :  { %v3414_v4 = vand.u32 4294901760, %v177_v13  ;;  %v864_v57 = vmul.f32 %v860_v40, %v61_v47  ;;  %v336_v50 = vand.u32 4294901760, %v335_v42  ;;  %v3873_v27 = vand.u32 4294901760, %v3387_v8 }
  0x2b   :  { %2389 = vmatpush3.bf16.msk.msra.mxu0 %vm3329_vm0, %v3867_v22  ;;  %2581 = vmatpush3.bf16.msk.msra.mxu1 %vm3329_vm0, %v3867_v22  ;;  %v2398_v22 = vpack.c.bf16 %v318_v2, %v312_v55  ;;  %v77_v56 = vsel %vm3356_vm2, %v1557_v19, %v2825_v0  ;;  %v3426_v45 = vsub.f32 %v163_v63, %v163_v63  ;;  %v342_v55 = vand.u32 4294901760, %v341_v21 }
  0x2c   :  { %2391 = vmatprep.subr.bf16.mxu0 %v2390_v5  ;;  %2583 = vmatprep.subr.bf16.mxu1 %v2390_v5  ;;  %v3428_v40 = vsub.f32 %v164_v32, %v164_v32  ;;  %v3431_v47 = vsub.f32 %v177_v13, %v3414_v4  ;;  %v3433_v20 = vand.u32 4294901760, %v864_v57  ;;  %v2402_v2 = vpack.c.bf16 %v330_v28, %v324_v23 }
  0x2d   :  { %v178_v42 = vmul.f32 %v174_v12, %v77_v56  ;;  %v865_v36 = vmul.f32 %v861_v48, %v77_v56  ;;  %v347_v0 = vsub.f32 %v3382_v9, %v3874_v35  ;;  %v166_v63 = vsel %vm3293_vm13, 1.0, %v2786_v39 }
  0x2e   :  { %1935 = vmatmul.mubr.f32.vlgmr.msra.gmra.mrb[0].mxu0 %v258_v6  ;;  %2163 = vmatmul.mubr.f32.vlgmr.msra.gmra.mrb[0].mxu1 %v945_v61  ;;  %v3872_v37 = vand.u32 4294901760, %v3431_v47  ;;  %v165_v6 = vsel %vm3276_vm15, 1.0, %v2786_v39  ;;  %v3443_v61 = vsub.f32 %v864_v57, %v3433_v20  ;;  %v358_v23 = vand.u32 4294901760, %v3426_v45 }
  0x2f   :  { %2393 = vmatpush3.bf16.msra.mxu0 %v2390_v5  ;;  %2585 = vmatpush3.bf16.msra.mxu1 %v2390_v5  ;;  %v353_v5 = vsub.f32 %v3387_v8, %v3873_v27  ;;  %v3451_v13 = vand.u32 4294901760, %v178_v42  ;;  %v3453_v19 = vand.u32 4294901760, %v865_v36  ;;  %v364_v46 = vand.u32 4294901760, %v3428_v40 }
  0x30   :  { %2395 = vmatprep.subr.bf16.mxu0 %v2394_v33  ;;  %2587 = vmatprep.subr.bf16.mxu1 %v2394_v33  ;;  %v267_v28 = vsub.f32 %v3431_v47, %v3872_v37  ;;  %v3877_v21 = vand.u32 4294901760, %v3443_v61  ;;  %v3461_v32 = vsub.f32 %v165_v6, %v165_v6  ;;  %v2406_v57 = vpack.c.bf16 %v342_v55, %v336_v50 }
  0x31   :  { %v3464_v39 = vsub.f32 %v178_v42, %v3451_v13  ;;  %v3467_v34 = vsub.f32 %v865_v36, %v3453_v19  ;;  %v3469_v48 = vsub.f32 %v166_v63, %v166_v63  ;;  %v348_v37 = vand.u32 4294901760, %v347_v0 }
  0x32   :  { %v268_v12 = vand.u32 4294901760, %v267_v28  ;;  %v954_v56 = vsub.f32 %v3443_v61, %v3877_v21  ;;  %v359_v27 = vsub.f32 %v3426_v45, %v358_v23  ;;  %v365_v36 = vsub.f32 %v3428_v40, %v364_v46 }
  0x33   :  { %2397 = vmatpush3.bf16.msra.mxu0 %v2394_v33  ;;  %2589 = vmatpush3.bf16.msra.mxu1 %v2394_v33  ;;  %v354_v33 = vand.u32 4294901760, %v353_v5  ;;  %v3876_v6 = vand.u32 4294901760, %v3464_v39  ;;  %v3875_v42 = vand.u32 4294901760, %v3467_v34  ;;  %v3482_v50 = vpack.c.bf16 %v292_v14, %v286_v7 }
  0x34   :  { %2399 = vmatprep.subr.bf16.mxu0 %v2398_v22  ;;  %2591 = vmatprep.subr.bf16.mxu1 %v2398_v22  ;;  %v955_v35 = vand.u32 4294901760, %v954_v56  ;;  %v370_v55 = vand.u32 4294901760, %v3461_v32  ;;  %v3962_v63 = vand.u32 4294901760, %v3169_v15  ;;  %v3964_v7 = vand.u32 4294901760, %v3209_v25 }
  0x35   :  { %1937 = vmatprep.mubr.f32.mxu0 %v268_v12  ;;  %3961 = vst [vmem:[#allocation5_spill] sm:$0xff] %v3482_v50  ;;  %v277_v0 = vsub.f32 %v3464_v39, %v3876_v6  ;;  %v964_v5 = vsub.f32 %v3467_v34, %v3875_v42  ;;  %v3965_v14 = vand.u32 4294901760, %v3211_v26  ;;  %v3967_v56 = vand.u32 4294901760, %v3263_v43 }
  0x36   :  { %v3495_v28 = vpack.c.bf16 %v3962_v63, %v298_v24  ;;  %v3968_v42 = vand.u32 4294901760, %v3265_v44  ;;  %v3969_v21 = vand.u32 4294901760, %v3284_v49  ;;  %v3970_v24 = vand.u32 4294901760, %v3311_v58  ;;  %2165 = vmatprep.mubr.f32.mxu1 %v955_v35 }
  0x37   :  { %2401 = vmatpush3.bf16.msra.mxu0 %v2398_v22  ;;  %2593 = vmatpush3.bf16.msra.mxu1 %v2398_v22  ;;  %v376_v22 = vand.u32 4294901760, %v3469_v48  ;;  %v3502_v12 = vpack.c.bf16 %v3965_v14, %v3964_v7  ;;  %v965_v50 = vand.u32 4294901760, %v964_v5  ;;  %v3971_v16 = vand.u32 4294901760, %v3382_v9 }
  0x38   :  { %3963 = vst [vmem:[#allocation6_spill] sm:$0xff] %v3495_v28  ;;  %2403 = vmatprep.subr.bf16.mxu0 %v2402_v2  ;;  %2595 = vmatprep.subr.bf16.mxu1 %v2402_v2  ;;  %v3508_v6 = vpack.c.bf16 %v3968_v42, %v3967_v56  ;;  %v3514_v63 = vpack.c.bf16 %v3970_v24, %v3969_v21  ;;  %v278_v28 = vand.u32 4294901760, %v277_v0  ;;  %v3972_v7 = vand.u32 4294901760, %v3387_v8 }
  0x39   :  { %3966 = vst [vmem:[#allocation7_spill] sm:$0xff] %v3502_v12  ;;  %v3522_v12 = vpack.c.bf16 %v364_v46, %v358_v23  ;;  %v3524_v38 = vpack.c.bf16 %v376_v22, %v370_v55  ;;  %v2410_v42 = vpack.c.bf16 %v354_v33, %v348_v37  ;;  %v360_v21 = vand.u32 4294901760, %v359_v27  ;;  %2166 = vmatmul.mubr.f32.gmra.mrb[2].mxu1 %v965_v50 }
  0x3a   :  { %v3520_v14 = vpack.c.bf16 %v3972_v7, %v3971_v16  ;;  %v366_v56 = vand.u32 4294901760, %v365_v36  ;;  %v371_v35 = vsub.f32 %v3461_v32, %v370_v55  ;;  %v377_v0 = vsub.f32 %v3469_v48, %v376_v22  ;;  %1938 = vmatmul.mubr.f32.gmra.mrb[2].mxu0 %v278_v28  ;;  %2200 = vmatprep.mubr.f32.mxu1 %v3064_v54 }
  0x3b   :  { %2405 = vmatpush3.bf16.msra.mxu0 %v2402_v2  ;;  %2597 = vmatpush3.bf16.msra.mxu1 %v2402_v2  ;;  %v2422_v23 = vpack.c.bf16 %v3090_v60, %v3054_v52  ;;  %v2426_v46 = vpack.c.bf16 %v3169_v15, %v3131_v3  ;;  %v2434_v52 = vpack.c.bf16 %v3265_v44, %v3263_v43  ;;  %v3976_v43 = vand.u32 4294901760, %v3113_v62 }
  0x3c   :  { %2407 = vmatprep.subr.bf16.mxu0 %v2406_v57  ;;  %2599 = vmatprep.subr.bf16.mxu1 %v2406_v57  ;;  %v2414_v16 = vpack.c.bf16 %v366_v56, %v360_v21  ;;  %v372_v2 = vand.u32 4294901760, %v371_v35  ;;  %v378_v37 = vand.u32 4294901760, %v377_v0  ;;  %v2438_v60 = vpack.c.bf16 %v3311_v58, %v3284_v49  ;;  %v3980_v44 = vld [vmem:[#allocation5_spill] sm:$0xff] }
  0x3d   :  { %1972 = vmatprep.mubr.f32.mxu0 %v3052_v51  ;;  %v2442_v3 = vpack.c.bf16 %v3387_v8, %v3382_v9  ;;  %v2446_v15 = vpack.c.bf16 %v3428_v40, %v3426_v45  ;;  %v3973_v9 = vmov 1.0|1.0   ;;  %vm3974_vm14 = vnez %v3906_v41 }
  0x3e   :  { %v2418_v27 = vpack.c.bf16 %v378_v37, %v372_v2  ;;  %vm3977_vm11 = vnez %v3915_v53  ;;  %v3981_v49 = vand.u32 4294901760, %v3224_v30  ;;  %v3982_v8 = vand.u32 4294901760, %v3227_v31 }
  0x3f   :  { %2409 = vmatpush3.bf16.msra.mxu0 %v2406_v57  ;;  %2601 = vmatpush3.bf16.msra.mxu1 %v2406_v57  ;;  %v2430_v57 = vpack.c.bf16 %v3211_v26, %v3209_v25  ;;  %v2450_v25 = vpack.c.bf16 %v3469_v48, %v3461_v32  ;;  %v3975_v26 = vand.u32 4294901760, %v3088_v59  ;;  %v3983_v58 = vld [vmem:[#allocation6_spill] sm:$0xff]  ;;  %v3984_v45 = vand.u32 4294901760, %v3431_v47 }
  0x40   :  { %2411 = vmatprep.subr.bf16.mxu0 %v2410_v42  ;;  %2603 = vmatprep.subr.bf16.mxu1 %v2410_v42  ;;  %v3985_v40 = vand.u32 4294901760, %v3443_v61  ;;  %v3988_v32 = vld [vmem:[#allocation7_spill] sm:$0xff] }
  0x43   :  { %2413 = vmatpush3.bf16.msra.mxu0 %v2410_v42  ;;  %2605 = vmatpush3.bf16.msra.mxu1 %v2410_v42 }
  0x44   :  { %2415 = vmatprep.subr.bf16.mxu0 %v2414_v16  ;;  %2607 = vmatprep.subr.bf16.mxu1 %v2414_v16 }
  0x47   :  { %2417 = vmatpush3.bf16.msra.mxu0 %v2414_v16  ;;  %2609 = vmatpush3.bf16.msra.mxu1 %v2414_v16 }
  0x48   :  { %2419 = vmatprep.subr.bf16.mxu0 %v2418_v27  ;;  %2611 = vmatprep.subr.bf16.mxu1 %v2418_v27 }
  0x4b   :  { %2421 = vmatpush3.bf16.msra.mxu0 %v2418_v27  ;;  %2613 = vmatpush3.bf16.msra.mxu1 %v2418_v27 }
  0x4c   :  { %2423 = vmatprep.subr.bf16.mxu0 %v2422_v23  ;;  %2615 = vmatprep.subr.bf16.mxu1 %v2422_v23 }
  0x4e   :  { %1973 = vmatmul.mubr.f32.vlgmr.msra.gmra.mrb[0].mxu0 %v3145_v10  ;;  %2201 = vmatmul.mubr.f32.vlgmr.msra.gmra.mrb[0].mxu1 %v3147_v11 }
  0x4f   :  { %2425 = vmatpush3.bf16.msra.mxu0 %v2422_v23  ;;  %2617 = vmatpush3.bf16.msra.mxu1 %v2422_v23 }
  0x50   :  { %2427 = vmatprep.subr.bf16.mxu0 %v2426_v46  ;;  %2619 = vmatprep.subr.bf16.mxu1 %v2426_v46 }
  0x51   :  { %1975 = vmatprep.mubr.f32.mxu0 %v3414_v4  ;;  %2203 = vmatprep.mubr.f32.mxu1 %v3433_v20 }
  0x52   :  { %1976 = vmatmul.mubr.f32.gmra.mrb[2].mxu0 %v3451_v13  ;;  %2204 = vmatmul.mubr.f32.gmra.mrb[2].mxu1 %v3453_v19 }
  0x53   :  { %2429 = vmatpush3.bf16.msra.mxu0 %v2426_v46  ;;  %2621 = vmatpush3.bf16.msra.mxu1 %v2426_v46 }
  0x54   :  { %2431 = vmatprep.subr.bf16.mxu0 %v2430_v57  ;;  %2623 = vmatprep.subr.bf16.mxu1 %v2430_v57 }
  0x55   :  { %2010 = vmatprep.mubr.f32.mxu0 %v3088_v59  ;;  %2238 = vmatprep.mubr.f32.mxu1 %v3113_v62 }
  0x57   :  { %2433 = vmatpush3.bf16.msra.mxu0 %v2430_v57  ;;  %2625 = vmatpush3.bf16.msra.mxu1 %v2430_v57 }
  0x58   :  { %2435 = vmatprep.subr.bf16.mxu0 %v2434_v52  ;;  %2627 = vmatprep.subr.bf16.mxu1 %v2434_v52 }
  0x5b   :  { %2437 = vmatpush3.bf16.msra.mxu0 %v2434_v52  ;;  %2629 = vmatpush3.bf16.msra.mxu1 %v2434_v52 }
  0x5c   :  { %2439 = vmatprep.subr.bf16.mxu0 %v2438_v60  ;;  %2631 = vmatprep.subr.bf16.mxu1 %v2438_v60 }
  0x5f   :  { %2441 = vmatpush3.bf16.msra.mxu0 %v2438_v60  ;;  %2633 = vmatpush3.bf16.msra.mxu1 %v2438_v60 }
  0x60   :  { %2443 = vmatprep.subr.bf16.mxu0 %v2442_v3  ;;  %2635 = vmatprep.subr.bf16.mxu1 %v2442_v3 }
  0x63   :  { %2445 = vmatpush3.bf16.msra.mxu0 %v2442_v3  ;;  %2637 = vmatpush3.bf16.msra.mxu1 %v2442_v3 }
  0x64   :  { %2447 = vmatprep.subr.bf16.mxu0 %v2446_v15  ;;  %2639 = vmatprep.subr.bf16.mxu1 %v2446_v15 }
  0x67   :  { %2449 = vmatpush3.bf16.msra.mxu0 %v2446_v15  ;;  %2641 = vmatpush3.bf16.msra.mxu1 %v2446_v15 }
  0x68   :  { %2451 = vmatprep.subr.bf16.mxu0 %v2450_v25  ;;  %2643 = vmatprep.subr.bf16.mxu1 %v2450_v25 }
  0x6b   :  { %2453 = vmatpush3.bf16.msra.mxu0 %v2450_v25  ;;  %2645 = vmatpush3.bf16.msra.mxu1 %v2450_v25 }
  0x6c   :  { %2455 = vmatprep.subr.msk.bf16.mxu0 %vm2870_vm10, %v3973_v9  ;;  %2647 = vmatprep.subr.msk.bf16.mxu1 %vm2870_vm10, %v3973_v9 }
  0x6e   :  { %2011 = vmatmul.mubr.f32.vlgmr.msra.gmra.mrb[0].mxu0 %v3224_v30  ;;  %2239 = vmatmul.mubr.f32.vlgmr.msra.gmra.mrb[0].mxu1 %v3227_v31  ;;  %v3986_v30 = vand.u32 4294901760, %v3464_v39  ;;  %v3987_v31 = vand.u32 4294901760, %v3467_v34 }
  0x6f   :  { %2457 = vmatpush3.bf16.msk.msra.mxu0 %vm2870_vm10, %v3973_v9  ;;  %2649 = vmatpush3.bf16.msk.msra.mxu1 %vm2870_vm10, %v3973_v9 }
  0x70   :  { %2459 = vmatprep.subr.msk.bf16.mxu0 %vm2930_vm5, %v3973_v9  ;;  %2651 = vmatprep.subr.msk.bf16.mxu1 %vm2930_vm5, %v3973_v9 }
  0x71   :  { %2013 = vmatprep.mubr.f32.mxu0 %v3431_v47  ;;  %2241 = vmatprep.mubr.f32.mxu1 %v3443_v61 }
  0x72   :  { %2014 = vmatmul.mubr.f32.gmra.mrb[2].mxu0 %v3464_v39  ;;  %2242 = vmatmul.mubr.f32.gmra.mrb[2].mxu1 %v3467_v34 }
  0x73   :  { %2461 = vmatpush3.bf16.msk.msra.mxu0 %vm2930_vm5, %v3973_v9  ;;  %2653 = vmatpush3.bf16.msk.msra.mxu1 %vm2930_vm5, %v3973_v9 }
  0x74   :  { %2463 = vmatprep.subr.msk.bf16.mxu0 %vm3974_vm14, %v3973_v9  ;;  %2655 = vmatprep.subr.msk.bf16.mxu1 %vm3974_vm14, %v3973_v9 }
  0x75   :  { %2048 = vmatprep.mubr.f32.mxu0 %v3975_v26  ;;  %2276 = vmatprep.mubr.f32.mxu1 %v3976_v43 }
  0x77   :  { %2465 = vmatpush3.bf16.msk.msra.mxu0 %vm3974_vm14, %v3973_v9  ;;  %2657 = vmatpush3.bf16.msk.msra.mxu1 %vm3974_vm14, %v3973_v9 }
  0x78   :  { %2467 = vmatprep.subr.msk.bf16.mxu0 %vm3977_vm11, %v3973_v9  ;;  %2659 = vmatprep.subr.msk.bf16.mxu1 %vm3977_vm11, %v3973_v9 }
  0x7b   :  { %2469 = vmatpush3.bf16.msk.msra.mxu0 %vm3977_vm11, %v3973_v9  ;;  %2661 = vmatpush3.bf16.msk.msra.mxu1 %vm3977_vm11, %v3973_v9 }
  0x7c   :  { %2471 = vmatprep.subr.msk.bf16.mxu0 %vm3122_vm9, %v3973_v9  ;;  %2663 = vmatprep.subr.msk.bf16.mxu1 %vm3122_vm9, %v3973_v9 }
  0x7f   :  { %2473 = vmatpush3.bf16.msk.msra.mxu0 %vm3122_vm9, %v3973_v9  ;;  %2665 = vmatpush3.bf16.msk.msra.mxu1 %vm3122_vm9, %v3973_v9 }
  0x80   :  { %2475 = vmatprep.subr.msk.bf16.mxu0 %vm3184_vm12, %v3973_v9  ;;  %2667 = vmatprep.subr.msk.bf16.mxu1 %vm3184_vm12, %v3973_v9 }
  0x83   :  { %2477 = vmatpush3.bf16.msk.msra.mxu0 %vm3184_vm12, %v3973_v9  ;;  %2669 = vmatpush3.bf16.msk.msra.mxu1 %vm3184_vm12, %v3973_v9 }
  0x84   :  { %2479 = vmatprep.subr.msk.bf16.mxu0 %vm3258_vm4, %v3973_v9  ;;  %2671 = vmatprep.subr.msk.bf16.mxu1 %vm3258_vm4, %v3973_v9 }
  0x87   :  { %2481 = vmatpush3.bf16.msk.msra.mxu0 %vm3258_vm4, %v3973_v9  ;;  %2673 = vmatpush3.bf16.msk.msra.mxu1 %vm3258_vm4, %v3973_v9 }
  0x88   :  { %2483 = vmatprep.subr.msk.bf16.mxu0 %vm3329_vm0, %v3973_v9  ;;  %2675 = vmatprep.subr.msk.bf16.mxu1 %vm3329_vm0, %v3973_v9 }
  0x8b   :  { %2485 = vmatpush3.bf16.msk.msra.mxu0 %vm3329_vm0, %v3973_v9  ;;  %2677 = vmatpush3.bf16.msk.msra.mxu1 %vm3329_vm0, %v3973_v9 }
  0x8c   :  { %2487 = vmatprep.subr.bf16.mxu0 %v3980_v44  ;;  %2679 = vmatprep.subr.bf16.mxu1 %v3980_v44 }
  0x8e   :  { %2049 = vmatmul.mubr.f32.vlgmr.msra.gmra.mrb[0].mxu0 %v3981_v49  ;;  %2277 = vmatmul.mubr.f32.vlgmr.msra.gmra.mrb[0].mxu1 %v3982_v8 }
  0x8f   :  { %2489 = vmatpush3.bf16.msra.mxu0 %v3980_v44  ;;  %2681 = vmatpush3.bf16.msra.mxu1 %v3980_v44 }
  0x90   :  { %2491 = vmatprep.subr.bf16.mxu0 %v3983_v58  ;;  %2683 = vmatprep.subr.bf16.mxu1 %v3983_v58 }
  0x91   :  { %2051 = vmatprep.mubr.f32.mxu0 %v3984_v45  ;;  %2279 = vmatprep.mubr.f32.mxu1 %v3985_v40 }
  0x92   :  { %2052 = vmatmul.mubr.f32.gmra.mrb[2].mxu0 %v3986_v30  ;;  %2280 = vmatmul.mubr.f32.gmra.mrb[2].mxu1 %v3987_v31 }
  0x93   :  { %2493 = vmatpush3.bf16.msra.mxu0 %v3983_v58  ;;  %2685 = vmatpush3.bf16.msra.mxu1 %v3983_v58 }
  0x94   :  { %2495 = vmatprep.subr.bf16.mxu0 %v3988_v32  ;;  %2687 = vmatprep.subr.bf16.mxu1 %v3988_v32 }
  0x95   :  { %2086 = vmatprep.mubr.f32.mxu0 %v3052_v51  ;;  %2314 = vmatprep.mubr.f32.mxu1 %v3064_v54 }
  0x97   :  { %2497 = vmatpush3.bf16.msra.mxu0 %v3988_v32  ;;  %2689 = vmatpush3.bf16.msra.mxu1 %v3988_v32 }
  0x98   :  { %2499 = vmatprep.subr.bf16.mxu0 %v3508_v6  ;;  %2691 = vmatprep.subr.bf16.mxu1 %v3508_v6 }
  0x9b   :  { %2501 = vmatpush3.bf16.msra.mxu0 %v3508_v6  ;;  %2693 = vmatpush3.bf16.msra.mxu1 %v3508_v6 }
  0x9c   :  { %2503 = vmatprep.subr.bf16.mxu0 %v3514_v63  ;;  %2695 = vmatprep.subr.bf16.mxu1 %v3514_v63 }
  0x9f   :  { %2505 = vmatpush3.bf16.msra.mxu0 %v3514_v63  ;;  %2697 = vmatpush3.bf16.msra.mxu1 %v3514_v63 }
  0xa0   :  { %2507 = vmatprep.subr.bf16.mxu0 %v3520_v14  ;;  %2699 = vmatprep.subr.bf16.mxu1 %v3520_v14 }
  0xa3   :  { %2509 = vmatpush3.bf16.msra.mxu0 %v3520_v14  ;;  %2701 = vmatpush3.bf16.msra.mxu1 %v3520_v14 }
  0xa4   :  { %2511 = vmatprep.subr.bf16.mxu0 %v3522_v12  ;;  %2703 = vmatprep.subr.bf16.mxu1 %v3522_v12 }
  0xa7   :  { %2513 = vmatpush3.bf16.msra.mxu0 %v3522_v12  ;;  %2705 = vmatpush3.bf16.msra.mxu1 %v3522_v12 }
  0xa8   :  { %2515 = vmatprep.subr.bf16.mxu0 %v3524_v38  ;;  %2707 = vmatprep.subr.bf16.mxu1 %v3524_v38 }
  0xab   :  { %2517 = vmatpush3.bf16.msra.mxu0 %v3524_v38  ;;  %2709 = vmatpush3.bf16.msra.mxu1 %v3524_v38 }
  0xac   :  { %2519 = vmatprep.subr.msk.bf16.mxu0 %vm2870_vm10, %v3973_v9  ;;  %2711 = vmatprep.subr.msk.bf16.mxu1 %vm2870_vm10, %v3973_v9 }
  0xae   :  { %2087 = vmatmul.mubr.f32.vlgmr.msra.gmra.mrb[0].mxu0 %v3145_v10  ;;  %2315 = vmatmul.mubr.f32.vlgmr.msra.gmra.mrb[0].mxu1 %v3147_v11 }
  0xaf   :  { %2521 = vmatpush3.bf16.msk.msra.mxu0 %vm2870_vm10, %v3973_v9  ;;  %2713 = vmatpush3.bf16.msk.msra.mxu1 %vm2870_vm10, %v3973_v9  ;;  %vm853_vm10 = vcmask 31744  }
  0xb0   :  { %2523 = vmatprep.subr.msk.bf16.mxu0 %vm2930_vm5, %v3973_v9  ;;  %2715 = vmatprep.subr.msk.bf16.mxu1 %vm2930_vm5, %v3973_v9 }
  0xb1   :  { %2089 = vmatprep.mubr.f32.mxu0 %v3414_v4  ;;  %2317 = vmatprep.mubr.f32.mxu1 %v3433_v20 }
  0xb2   :  { %2090 = vmatmul.mubr.f32.gmra.mrb[2].mxu0 %v3451_v13  ;;  %2318 = vmatmul.mubr.f32.gmra.mrb[2].mxu1 %v3453_v19 }
  0xb3   :  { %2525 = vmatpush3.bf16.msk.msra.mxu0 %vm2930_vm5, %v3973_v9  ;;  %2717 = vmatpush3.bf16.msk.msra.mxu1 %vm2930_vm5, %v3973_v9 }
  0xb4   :  { %2527 = vmatprep.subr.msk.bf16.mxu0 %vm3974_vm14, %v3973_v9  ;;  %2719 = vmatprep.subr.msk.bf16.mxu1 %vm3974_vm14, %v3973_v9 }
  0xb5   :  { %2124 = vmatprep.mubr.f32.mxu0 %v3052_v51  ;;  %2352 = vmatprep.mubr.f32.mxu1 %v3064_v54 }
  0xb7   :  { %2529 = vmatpush3.bf16.msk.msra.mxu0 %vm3974_vm14, %v3973_v9  ;;  %2721 = vmatpush3.bf16.msk.msra.mxu1 %vm3974_vm14, %v3973_v9 }
  0xb8   :  { %2531 = vmatprep.subr.msk.bf16.mxu0 %vm3977_vm11, %v3973_v9  ;;  %2723 = vmatprep.subr.msk.bf16.mxu1 %vm3977_vm11, %v3973_v9 }
  0xbb   :  { %2533 = vmatpush3.bf16.msk.msra.mxu0 %vm3977_vm11, %v3973_v9  ;;  %2725 = vmatpush3.bf16.msk.msra.mxu1 %vm3977_vm11, %v3973_v9 }
  0xbc   :  { %2535 = vmatprep.subr.msk.bf16.mxu0 %vm3122_vm9, %v3973_v9  ;;  %2727 = vmatprep.subr.msk.bf16.mxu1 %vm3122_vm9, %v3973_v9 }
  0xbf   :  { %2537 = vmatpush3.bf16.msk.msra.mxu0 %vm3122_vm9, %v3973_v9  ;;  %2729 = vmatpush3.bf16.msk.msra.mxu1 %vm3122_vm9, %v3973_v9 }
  0xc0   :  { %2539 = vmatprep.subr.msk.bf16.mxu0 %vm3184_vm12, %v3973_v9  ;;  %2731 = vmatprep.subr.msk.bf16.mxu1 %vm3184_vm12, %v3973_v9 }
  0xc3   :  { %2541 = vmatpush3.bf16.msk.msra.mxu0 %vm3184_vm12, %v3973_v9  ;;  %2733 = vmatpush3.bf16.msk.msra.mxu1 %vm3184_vm12, %v3973_v9 }
  0xc4   :  { %2543 = vmatprep.subr.msk.bf16.mxu0 %vm3258_vm4, %v3973_v9  ;;  %2735 = vmatprep.subr.msk.bf16.mxu1 %vm3258_vm4, %v3973_v9 }
  0xc7   :  { %2545 = vmatpush3.bf16.msk.msra.mxu0 %vm3258_vm4, %v3973_v9  ;;  %2737 = vmatpush3.bf16.msk.msra.mxu1 %vm3258_vm4, %v3973_v9 }
  0xc8   :  { %2547 = vmatprep.subr.msk.bf16.mxu0 %vm3329_vm0, %v3973_v9  ;;  %2739 = vmatprep.subr.msk.bf16.mxu1 %vm3329_vm0, %v3973_v9 }
  0xcb   :  { %2549 = vmatpush3.bf16.msk.msra.mxu0 %vm3329_vm0, %v3973_v9  ;;  %2741 = vmatpush3.bf16.msk.msra.mxu1 %vm3329_vm0, %v3973_v9 }
  0xce   :  { %2125 = vmatmul.mubr.f32.vlgmr.msra.gmra.mrb[0].mxu0 %v3145_v10  ;;  %2353 = vmatmul.mubr.f32.vlgmr.msra.gmra.mrb[0].mxu1 %v3147_v11 }
  0xcf   :  { %2127 = vmatprep.mubr.f32.mxu0 %v3414_v4  ;;  %2355 = vmatprep.mubr.f32.mxu1 %v3433_v20 }
  0xd2   :  { %2128 = vmatmul.mubr.f32.gmra.mrb[2].mxu0 %v3451_v13  ;;  %2356 = vmatmul.mubr.f32.gmra.mrb[2].mxu1 %v3453_v19 }
 0x1a1   :  { %v2126_v18 = vpop.f32.mrb[0].mxu0  ;;  %v2354_v29 = vpop.f32.mrb[0].mxu1 }
 0x1a2   :  { %855 = vst.msk [vmem:[%s3853_s5 + $0x8] sm:$0xff] %vm853_vm10, %v2126_v18  ;;  %1541 = vst.msk [vmem:[%s3854_s6 + $0x8] sm:$0xff] %vm853_vm10, %v2354_v29  ;;  %v831_v41 = vpop.f32.mrb[1].mxu0  ;;  %v1518_v51 = vpop.f32.mrb[1].mxu1 }
 0x1a3   :  { %854 = vst.msk [vmem:[%s3853_s5] sm:$0xff] %vm853_vm10, %v831_v41  ;;  %1540 = vst.msk [vmem:[%s3854_s6] sm:$0xff] %vm853_vm10, %v1518_v51 }
 0x1a5   :  { %v2129_v53 = vpop.f32.mrb[2].mxu0  ;;  %v2357_v54 = vpop.f32.mrb[2].mxu1 }
 0x1a6   :  { %857 = vst.msk [vmem:[%s3853_s5 + $0x18] sm:$0xff] %vm853_vm10, %v2129_v53  ;;  %1543 = vst.msk [vmem:[%s3854_s6 + $0x18] sm:$0xff] %vm853_vm10, %v2357_v54  ;;  %v843_v1 = vpop.f32.mrb[3].mxu0  ;;  %v1530_v10 = vpop.f32.mrb[3].mxu1 }
 0x1a7   :  { %856 = vst.msk [vmem:[%s3853_s5 + $0x10] sm:$0xff] %vm853_vm10, %v843_v1  ;;  %1542 = vst.msk [vmem:[%s3854_s6 + $0x10] sm:$0xff] %vm853_vm10, %v1530_v10 }

</bundles_post_ra>
